<compile_context>
chip_gen: v7x
topology: tpu7x:2x2x1
jax: 0.10.0
libtpu: 0.0.40
codegen_flags: <defaults>
</compile_context>

<pallas_src>
import jax
import jax.numpy as jnp
from jax.experimental import pallas as pl
from jax.experimental.pallas import tpu as pltpu

_LANE = 128   # lane-dense padding for feature dims
_ROW = 16     # sublane padding for row dims (multiple of 16 -> safe for bf16 packing, of 8 for f32)


def _pad_axis(x, axis, mult, value=0):
    size = x.shape[axis]
    pad = (-size) % mult
    if pad == 0:
        return x
    widths = [(0, 0)] * x.ndim
    widths[axis] = (0, pad)
    return jnp.pad(x, widths, constant_values=value)


def _make_kernel(n_shared_layers, compute_dtype):
    L = n_shared_layers

    def kernel(*refs):
        did_ref = refs[0]                           # (nd_p, 1) int32, padded entries = -1
        z_ref = refs[1]                             # (B_p, K_p)  compute_dtype
        shared_refs = refs[2:2 + 2 * L]             # [W0, b0, W1, b1, ...]
        w1_ref, b1_ref, w2_ref, b2_ref = refs[2 + 2 * L:6 + 2 * L]   # per-head blocks
        yw_ref, yv_ref, y_ref = refs[6 + 2 * L:9 + 2 * L]            # outputs (resident)
        xsel_ref, yw_scr, yv_acc = refs[9 + 2 * L:12 + 2 * L]        # VMEM scratch

        h = pl.program_id(0)
        n_heads = pl.num_programs(0)
        nd_p = did_ref.shape[0]
        b_p = z_ref.shape[0]
        did = did_ref[...]                          # (nd_p, 1)

        @pl.when(h == 0)
        def _init():
            # ---- shared FCNet: whole Linear->ReLU chain fused, intermediates stay in VMEM ----
            a = z_ref[...]
            a_f32 = None
            for i in range(L):
                w = shared_refs[2 * i][...]                          # bf16 (din_p, dout_p)
                b = shared_refs[2 * i + 1][...]                      # f32  (1, dout_p)
                acc = jnp.dot(a, w, preferred_element_type=jnp.float32) + b
                a_f32 = jnp.maximum(acc, 0.0)        # ReLU after EVERY linear (FCNet default)
                a = a_f32.astype(compute_dtype)
            yw_scr[...] = a_f32                                      # (B_p, N_p) f32

            # ---- gather z[dataset_id] via one-hot MXU matmul (no per-row DMA / loop).
            # dataset_id values outside [0, B) (incl. -1 padding) simply produce zero rows
            # instead of OOB reads.
            cols = jax.lax.broadcasted_iota(jnp.int32, (nd_p, b_p), 1)
            one_hot = (did == cols).astype(compute_dtype)            # (nd_p, B_p)
            xsel_ref[...] = jnp.dot(one_hot, z_ref[...],
                                    preferred_element_type=jnp.float32).astype(compute_dtype)
            yv_acc[...] = jnp.zeros_like(yv_acc)

        # ---- conditioned head h applied to ALL selected rows (real MXU matmuls);
        #      this head's weights were DMA'd exactly once for all its rows. ----
        x = xsel_ref[...]                                            # (nd_p, K_p) bf16
        h1 = jnp.dot(x, w1_ref[0], preferred_element_type=jnp.float32) + b1_ref[0]
        h1 = jnp.maximum(h1, 0.0).astype(compute_dtype)
        o = jnp.dot(h1, w2_ref[0], preferred_element_type=jnp.float32) + b2_ref[0]
        o = jnp.maximum(o, 0.0)                                      # ReLU on final layer too
        yv_acc[...] += jnp.where(did == h, o, 0.0)                   # keep rows of this head

        @pl.when(h == n_heads - 1)
        def _finalize():
            yv = yv_acc[...]
            yw = yw_scr[...]
            yw_ref[...] = yw
            yv_ref[...] = yv
            y_ref[...] = yv + yw                     # fused y = y_v + y_w (single lane-dense store)

    return kernel


def multi_decoder_rna_forward(z, dataset_id, shared_W, shared_b,
                              cond_W1, cond_b1, cond_W2, cond_b2,
                              compute_dtype=jnp.bfloat16):
    B, n_in = z.shape
    nd = dataset_id.shape[0]
    n_heads = cond_W1.shape[0]
    n_out = cond_W2.shape[2]
    L = len(shared_W)
    # torch's `y = y_v + y_w` is an elementwise broadcast add -> requires len(dataset_id) == batch.
    assert nd == B, "y = y_v + y_w requires len(dataset_id) == z.shape[0] (as in the torch module)"
    assert shared_W[-1].shape[1] == n_out

    # ---- pad to lane-dense feature dims (128) / 16-row sublane dims; cast matmul operands to bf16 ----
    z_p = _pad_axis(_pad_axis(z, 0, _ROW), 1, _LANE).astype(compute_dtype)
    did_p = _pad_axis(dataset_id.astype(jnp.int32), 0, _ROW, value=-1).reshape(-1, 1)

    sw_p, sb_p = [], []
    for w, b in zip(shared_W, shared_b):
        sw_p.append(_pad_axis(_pad_axis(w, 0, _LANE), 1, _LANE).astype(compute_dtype))
        sb_p.append(_pad_axis(b.reshape(1, -1), 1, _LANE).astype(jnp.float32))

    w1_p = _pad_axis(_pad_axis(cond_W1, 1, _LANE), 2, _LANE).astype(compute_dtype)
    b1_p = _pad_axis(cond_b1.reshape(n_heads, 1, -1), 2, _LANE).astype(jnp.float32)
    w2_p = _pad_axis(_pad_axis(cond_W2, 1, _LANE), 2, _LANE).astype(compute_dtype)
    b2_p = _pad_axis(cond_b2.reshape(n_heads, 1, -1), 2, _LANE).astype(jnp.float32)

    B_p, K_p = z_p.shape
    nd_p = did_p.shape[0]
    H_p = w1_p.shape[2]
    N_p = w2_p.shape[2]

    def _resident_spec(arr):
        # Full-array block with constant index -> DMA'd once, stays resident across the head loop.
        zeros = (0,) * arr.ndim
        return pl.BlockSpec(arr.shape, lambda h, _z=zeros: _z)

    in_specs = [_resident_spec(did_p), _resident_spec(z_p)]
    shared_flat = []
    for w, b in zip(sw_p, sb_p):
        in_specs += [_resident_spec(w), _resident_spec(b)]
        shared_flat += [w, b]
    in_specs += [
        pl.BlockSpec((1, K_p, H_p), lambda h: (h, 0, 0)),   # per-head weights: pipelined over heads,
        pl.BlockSpec((1, 1, H_p), lambda h: (h, 0, 0)),     # fetched exactly once per head
        pl.BlockSpec((1, H_p, N_p), lambda h: (h, 0, 0)),
        pl.BlockSpec((1, 1, N_p), lambda h: (h, 0, 0)),
    ]
    out_specs = (
        pl.BlockSpec((B_p, N_p), lambda h: (0, 0)),
        pl.BlockSpec((nd_p, N_p), lambda h: (0, 0)),
        pl.BlockSpec((nd_p, N_p), lambda h: (0, 0)),
    )
    out_shape = (
        jax.ShapeDtypeStruct((B_p, N_p), jnp.float32),
        jax.ShapeDtypeStruct((nd_p, N_p), jnp.float32),
        jax.ShapeDtypeStruct((nd_p, N_p), jnp.float32),
    )
    scratch_shapes = [
        pltpu.VMEM((nd_p, K_p), compute_dtype),   # gathered z rows
        pltpu.VMEM((B_p, N_p), jnp.float32),      # y_w
        pltpu.VMEM((nd_p, N_p), jnp.float32),     # y_v accumulator
    ]

    yw_p, yv_p, y_p = pl.pallas_call(
        _make_kernel(L, compute_dtype),
        grid=(n_heads,),
        in_specs=in_specs,
        out_specs=out_specs,
        out_shape=out_shape,
        scratch_shapes=scratch_shapes,
        compiler_params=pltpu.CompilerParams(
            # The head axis carries the y_v accumulator and the step-0 shared-path init,
            # so it must stay "arbitrary" (cannot be megacore-parallel).
            dimension_semantics=("arbitrary",),
        ),
    )(did_p, z_p, *shared_flat, w1_p, b1_p, w2_p, b2_p)

    return yw_p[:B, :n_out], yv_p[:nd, :n_out], y_p[:nd, :n_out]


# ----------------------------------------------------------------------------
if __name__ == "__main__":
    key = jax.random.PRNGKey(0)

    B = 8
    n_heads = 2
    n_input = 8
    n_output = 16
    n_hidden_shared = [32]      # decoder_shared: 8 -> 32 -> 16
    n_hidden_cond = 32          # each conditioned decoder: 8 -> 32 -> 16

    # --- shared decoder params (PyTorch Linear-style uniform init, stored (in, out)) ---
    dims = [n_input] + n_hidden_shared + [n_output]
    shared_W, shared_b = [], []
    for din, dout in zip(dims[:-1], dims[1:]):
        key, k1, k2 = jax.random.split(key, 3)
        bound = 1.0 / (din ** 0.5)
        shared_W.append(jax.random.uniform(k1, (din, dout), jnp.float32, -bound, bound))
        shared_b.append(jax.random.uniform(k2, (1, dout), jnp.float32, -bound, bound))

    # --- conditioned decoder params, stacked per head ---
    key, ka, kb, kc, kd = jax.random.split(key, 5)
    b1_ = 1.0 / (n_input ** 0.5)
    b2_ = 1.0 / (n_hidden_cond ** 0.5)
    cond_W1 = jax.random.uniform(ka, (n_heads, n_input, n_hidden_cond), jnp.float32, -b1_, b1_)
    cond_b1 = jax.random.uniform(kb, (n_heads, 1, n_hidden_cond), jnp.float32, -b1_, b1_)
    cond_W2 = jax.random.uniform(kc, (n_heads, n_hidden_cond, n_output), jnp.float32, -b2_, b2_)
    cond_b2 = jax.random.uniform(kd, (n_heads, 1, n_output), jnp.float32, -b2_, b2_)

    # --- inputs (dataset_id indexes both the heads and the rows of z, as in the torch code) ---
    key, kz = jax.random.split(key)
    z = jax.random.normal(kz, (B, n_input), jnp.float32)
    dataset_id = jnp.array([0, 1, 0, 1, 1, 0, 1, 0], dtype=jnp.int32)

    fwd = jax.jit(multi_decoder_rna_forward)
    y_w, y_v, y = fwd(z, dataset_id, shared_W, shared_b, cond_W1, cond_b1, cond_W2, cond_b2)
    jax.block_until_ready((y_w, y_v, y))

    # --- references ---
    def fc_f32(x, Ws, bs):
        for w, b in zip(Ws, bs):
            x = jnp.maximum(x @ w + b.reshape(1, -1), 0.0)
        return x

    def fc_bf16(x, Ws, bs):
        # emulates the kernel numerics: bf16 matmul operands, f32 accumulation / bias / ReLU
        a = x.astype(jnp.bfloat16)
        out = None
        for w, b in zip(Ws, bs):
            acc = jnp.dot(a, w.astype(jnp.bfloat16),
                          preferred_element_type=jnp.float32) + b.reshape(1, -1)
            out = jnp.maximum(acc, 0.0)
            a = out.astype(jnp.bfloat16)
        return out

    ids = [int(i) for i in dataset_id]

    # tight check against a reference using the same bf16/f32 mixed precision
    y_w_ref = fc_bf16(z, shared_W, shared_b)
    rows = [fc_bf16(z[i:i + 1], [cond_W1[i], cond_W2[i]], [cond_b1[i], cond_b2[i]]) for i in ids]
    y_v_ref = jnp.concatenate(rows, axis=0)
    y_ref = y_v_ref + y_w_ref
    assert jnp.allclose(y_w, y_w_ref, atol=1e-3), "y_w mismatch (bf16 reference)"
    assert jnp.allclose(y_v, y_v_ref, atol=1e-3), "y_v mismatch (bf16 reference)"
    assert jnp.allclose(y, y_ref, atol=2e-3), "y mismatch (bf16 reference)"

    # loose sanity check against the exact f32 torch semantics (bf16 quantization is intentional)
    y_w_f32 = fc_f32(z, shared_W, shared_b)
    rows32 = [fc_f32(z[i:i + 1], [cond_W1[i], cond_W2[i]], [cond_b1[i], cond_b2[i]]) for i in ids]
    y_v_f32 = jnp.concatenate(rows32, axis=0)
    assert jnp.allclose(y_w, y_w_f32, atol=0.15), "y_w far from f32 reference"
    assert jnp.allclose(y_v, y_v_f32, atol=0.15), "y_v far from f32 reference"
    assert jnp.allclose(y, y_v_f32 + y_w_f32, atol=0.3), "y far from f32 reference"

    print("KERNEL_OK")
</pallas_src>

<mosaic_0001>
module attributes {stable_mosaic.version = 11 : i64} {
  func.func @kernel(%arg0: i32, %arg1: memref<16x1xi32, #tpu.memory_space<vmem>>, %arg2: memref<16x128xbf16, #tpu.memory_space<vmem>>, %arg3: memref<128x128xbf16, #tpu.memory_space<vmem>>, %arg4: memref<1x128xf32, #tpu.memory_space<vmem>>, %arg5: memref<128x128xbf16, #tpu.memory_space<vmem>>, %arg6: memref<1x128xf32, #tpu.memory_space<vmem>>, %arg7: memref<1x128x128xbf16, #tpu.memory_space<vmem>>, %arg8: memref<1x1x128xf32, #tpu.memory_space<vmem>>, %arg9: memref<1x128x128xbf16, #tpu.memory_space<vmem>>, %arg10: memref<1x1x128xf32, #tpu.memory_space<vmem>>, %arg11: memref<16x128xf32, #tpu.memory_space<vmem>>, %arg12: memref<16x128xf32, #tpu.memory_space<vmem>>, %arg13: memref<16x128xf32, #tpu.memory_space<vmem>>, %arg14: memref<16x128xbf16, #tpu.memory_space<vmem>>, %arg15: memref<16x128xf32, #tpu.memory_space<vmem>>, %arg16: memref<16x128xf32, #tpu.memory_space<vmem>>) attributes {dimension_semantics = [#tpu.dimension_semantics<arbitrary>], iteration_bounds = array<i64: 2>, scalar_prefetch = 0 : i64, scratch_operands = 3 : i64, tpu.core_type = #tpu.core_type<tc>, window_params = [{pipeline_mode = #tpu.pipeline_mode<synchronous>, transform_indices = @transform_0, window_bounds = array<i64: 16, 1>}, {pipeline_mode = #tpu.pipeline_mode<synchronous>, transform_indices = @transform_1, window_bounds = array<i64: 16, 128>}, {pipeline_mode = #tpu.pipeline_mode<synchronous>, transform_indices = @transform_2, window_bounds = array<i64: 128, 128>}, {pipeline_mode = #tpu.pipeline_mode<synchronous>, transform_indices = @transform_3, window_bounds = array<i64: 1, 128>}, {pipeline_mode = #tpu.pipeline_mode<synchronous>, transform_indices = @transform_4, window_bounds = array<i64: 128, 128>}, {pipeline_mode = #tpu.pipeline_mode<synchronous>, transform_indices = @transform_5, window_bounds = array<i64: 1, 128>}, {transform_indices = @transform_6, window_bounds = array<i64: 1, 128, 128>}, {transform_indices = @transform_7, window_bounds = array<i64: 1, 1, 128>}, {transform_indices = @transform_8, window_bounds = array<i64: 1, 128, 128>}, {transform_indices = @transform_9, window_bounds = array<i64: 1, 1, 128>}, {pipeline_mode = #tpu.pipeline_mode<synchronous>, transform_indices = @transform_10, window_bounds = array<i64: 16, 128>}, {pipeline_mode = #tpu.pipeline_mode<synchronous>, transform_indices = @transform_11, window_bounds = array<i64: 16, 128>}, {pipeline_mode = #tpu.pipeline_mode<synchronous>, transform_indices = @transform_12, window_bounds = array<i64: 16, 128>}]} {
    %c0 = arith.constant 0 : index
    %c0_0 = arith.constant 0 : index
    %0 = vector.load %arg1[%c0, %c0_0] : memref<16x1xi32, #tpu.memory_space<vmem>>, vector<16x1xi32>
    %c0_i32 = arith.constant 0 : i32
    %1 = arith.cmpi eq, %arg0, %c0_i32 : i32
    %2 = arith.extui %1 : i1 to i32
    %c0_i32_1 = arith.constant 0 : i32
    %3 = arith.cmpi ne, %2, %c0_i32_1 : i32
    scf.if %3 {
      %c0_25 = arith.constant 0 : index
      %c0_26 = arith.constant 0 : index
      %36 = vector.load %arg2[%c0_25, %c0_26] : memref<16x128xbf16, #tpu.memory_space<vmem>>, vector<16x128xbf16>
      %c0_27 = arith.constant 0 : index
      %c0_28 = arith.constant 0 : index
      %37 = vector.load %arg3[%c0_27, %c0_28] : memref<128x128xbf16, #tpu.memory_space<vmem>>, vector<128x128xbf16>
      %c0_29 = arith.constant 0 : index
      %c0_30 = arith.constant 0 : index
      %38 = vector.load %arg4[%c0_29, %c0_30] : memref<1x128xf32, #tpu.memory_space<vmem>>, vector<1x128xf32>
      %cst_31 = arith.constant dense<0.000000e+00> : vector<16x128xf32>
      %39 = tpu.matmul %36, %37, %cst_31 {dimension_numbers = #tpu.dot_dimension_numbers<[1], [0], [0], [1], [0, 0, 1, 1], [], []>} : vector<16x128xbf16>, vector<128x128xbf16>, vector<16x128xf32> -> vector<16x128xf32>
      %40 = vector.broadcast %38 : vector<1x128xf32> to vector<16x128xf32>
      %41 = arith.addf %39, %40 : vector<16x128xf32>
      %cst_32 = arith.constant 0.000000e+00 : f32
      %42 = vector.broadcast %cst_32 : f32 to vector<16x128xf32>
      %43 = arith.maximumf %41, %42 : vector<16x128xf32>
      %44 = arith.truncf %43 : vector<16x128xf32> to vector<16x128xbf16>
      %c0_33 = arith.constant 0 : index
      %c0_34 = arith.constant 0 : index
      %45 = vector.load %arg5[%c0_33, %c0_34] : memref<128x128xbf16, #tpu.memory_space<vmem>>, vector<128x128xbf16>
      %c0_35 = arith.constant 0 : index
      %c0_36 = arith.constant 0 : index
      %46 = vector.load %arg6[%c0_35, %c0_36] : memref<1x128xf32, #tpu.memory_space<vmem>>, vector<1x128xf32>
      %cst_37 = arith.constant dense<0.000000e+00> : vector<16x128xf32>
      %47 = tpu.matmul %44, %45, %cst_37 {dimension_numbers = #tpu.dot_dimension_numbers<[1], [0], [0], [1], [0, 0, 1, 1], [], []>} : vector<16x128xbf16>, vector<128x128xbf16>, vector<16x128xf32> -> vector<16x128xf32>
      %48 = vector.broadcast %46 : vector<1x128xf32> to vector<16x128xf32>
      %49 = arith.addf %47, %48 : vector<16x128xf32>
      %cst_38 = arith.constant 0.000000e+00 : f32
      %50 = vector.broadcast %cst_38 : f32 to vector<16x128xf32>
      %51 = arith.maximumf %49, %50 : vector<16x128xf32>
      %c0_39 = arith.constant 0 : index
      %c0_40 = arith.constant 0 : index
      %52 = vector.load %arg15[%c0_39, %c0_40] : memref<16x128xf32, #tpu.memory_space<vmem>>, vector<16x128xf32>
      tpu.vector_store %arg15[%c0_39, %c0_40], %51 {strides = array<i32>} : memref<16x128xf32, #tpu.memory_space<vmem>>, vector<16x128xf32>,
      %53 = tpu.iota {dimensions = array<i32: 1>} : vector<16x16xi32>
      %54 = vector.broadcast %0 : vector<16x1xi32> to vector<16x16xi32>
      %55 = arith.cmpi eq, %54, %53 : vector<16x16xi32>
      %56 = arith.extui %55 : vector<16x16xi1> to vector<16x16xi32>
      %57 = arith.sitofp %56 : vector<16x16xi32> to vector<16x16xf32>
      %58 = arith.truncf %57 : vector<16x16xf32> to vector<16x16xbf16>
      %c0_41 = arith.constant 0 : index
      %c0_42 = arith.constant 0 : index
      %59 = vector.load %arg2[%c0_41, %c0_42] : memref<16x128xbf16, #tpu.memory_space<vmem>>, vector<16x128xbf16>
      %cst_43 = arith.constant dense<0.000000e+00> : vector<16x128xf32>
      %60 = tpu.matmul %58, %59, %cst_43 {dimension_numbers = #tpu.dot_dimension_numbers<[1], [0], [0], [1], [0, 0, 1, 1], [], []>} : vector<16x16xbf16>, vector<16x128xbf16>, vector<16x128xf32> -> vector<16x128xf32>
      %61 = arith.truncf %60 : vector<16x128xf32> to vector<16x128xbf16>
      %c0_44 = arith.constant 0 : index
      %c0_45 = arith.constant 0 : index
      %62 = vector.load %arg14[%c0_44, %c0_45] : memref<16x128xbf16, #tpu.memory_space<vmem>>, vector<16x128xbf16>
      tpu.vector_store %arg14[%c0_44, %c0_45], %61 {strides = array<i32>} : memref<16x128xbf16, #tpu.memory_space<vmem>>, vector<16x128xbf16>,
      %cst_46 = arith.constant 0.000000e+00 : f32
      %63 = vector.broadcast %cst_46 : f32 to vector<16x128xf32>
      %c0_47 = arith.constant 0 : index
      %c0_48 = arith.constant 0 : index
      %64 = vector.load %arg16[%c0_47, %c0_48] : memref<16x128xf32, #tpu.memory_space<vmem>>, vector<16x128xf32>
      tpu.vector_store %arg16[%c0_47, %c0_48], %63 {strides = array<i32>} : memref<16x128xf32, #tpu.memory_space<vmem>>, vector<16x128xf32>,
    } else {
    }
    %c0_2 = arith.constant 0 : index
    %c0_3 = arith.constant 0 : index
    %4 = vector.load %arg14[%c0_2, %c0_3] : memref<16x128xbf16, #tpu.memory_space<vmem>>, vector<16x128xbf16>
    %c0_4 = arith.constant 0 : index
    %c0_5 = arith.constant 0 : index
    %c0_6 = arith.constant 0 : index
    %5 = vector.load %arg7[%c0_4, %c0_5, %c0_6] : memref<1x128x128xbf16, #tpu.memory_space<vmem>>, vector<1x128x128xbf16>
    %6 = vector.shape_cast %5 : vector<1x128x128xbf16> to vector<128x128xbf16>
    %cst = arith.constant dense<0.000000e+00> : vector<16x128xf32>
    %7 = tpu.matmul %4, %6, %cst {dimension_numbers = #tpu.dot_dimension_numbers<[1], [0], [0], [1], [0, 0, 1, 1], [], []>} : vector<16x128xbf16>, vector<128x128xbf16>, vector<16x128xf32> -> vector<16x128xf32>
    %c0_7 = arith.constant 0 : index
    %c0_8 = arith.constant 0 : index
    %c0_9 = arith.constant 0 : index
    %8 = vector.load %arg8[%c0_7, %c0_8, %c0_9] : memref<1x1x128xf32, #tpu.memory_space<vmem>>, vector<1x1x128xf32>
    %9 = vector.shape_cast %8 : vector<1x1x128xf32> to vector<1x128xf32>
    %10 = vector.broadcast %9 : vector<1x128xf32> to vector<16x128xf32>
    %11 = arith.addf %7, %10 : vector<16x128xf32>
    %cst_10 = arith.constant 0.000000e+00 : f32
    %12 = vector.broadcast %cst_10 : f32 to vector<16x128xf32>
    %13 = arith.maximumf %11, %12 : vector<16x128xf32>
    %14 = arith.truncf %13 : vector<16x128xf32> to vector<16x128xbf16>
    %c0_11 = arith.constant 0 : index
    %c0_12 = arith.constant 0 : index
    %c0_13 = arith.constant 0 : index
    %15 = vector.load %arg9[%c0_11, %c0_12, %c0_13] : memref<1x128x128xbf16, #tpu.memory_space<vmem>>, vector<1x128x128xbf16>
    %16 = vector.shape_cast %15 : vector<1x128x128xbf16> to vector<128x128xbf16>
    %cst_14 = arith.constant dense<0.000000e+00> : vector<16x128xf32>
    %17 = tpu.matmul %14, %16, %cst_14 {dimension_numbers = #tpu.dot_dimension_numbers<[1], [0], [0], [1], [0, 0, 1, 1], [], []>} : vector<16x128xbf16>, vector<128x128xbf16>, vector<16x128xf32> -> vector<16x128xf32>
    %c0_15 = arith.constant 0 : index
    %c0_16 = arith.constant 0 : index
    %c0_17 = arith.constant 0 : index
    %18 = vector.load %arg10[%c0_15, %c0_16, %c0_17] : memref<1x1x128xf32, #tpu.memory_space<vmem>>, vector<1x1x128xf32>
    %19 = vector.shape_cast %18 : vector<1x1x128xf32> to vector<1x128xf32>
    %20 = vector.broadcast %19 : vector<1x128xf32> to vector<16x128xf32>
    %21 = arith.addf %17, %20 : vector<16x128xf32>
    %cst_18 = arith.constant 0.000000e+00 : f32
    %22 = vector.broadcast %cst_18 : f32 to vector<16x128xf32>
    %23 = arith.maximumf %21, %22 : vector<16x128xf32>
    %c0_19 = arith.constant 0 : index
    %c0_20 = arith.constant 0 : index
    %24 = vector.load %arg16[%c0_19, %c0_20] : memref<16x128xf32, #tpu.memory_space<vmem>>, vector<16x128xf32>
    %25 = vector.broadcast %arg0 : i32 to vector<16x1xi32>
    %26 = arith.cmpi eq, %0, %25 : vector<16x1xi32>
    %cst_21 = arith.constant 0.000000e+00 : f32
    %27 = vector.shape_cast %26 : vector<16x1xi1> to vector<16x1xi1>
    %28 = vector.broadcast %27 : vector<16x1xi1> to vector<16x128xi1>
    %29 = vector.broadcast %cst_21 : f32 to vector<16x128xf32>
    %30 = arith.select %28, %23, %29 : vector<16x128xi1>, vector<16x128xf32>
    %31 = arith.addf %24, %30 : vector<16x128xf32>
    %c0_22 = arith.constant 0 : index
    %c0_23 = arith.constant 0 : index
    %32 = vector.load %arg16[%c0_22, %c0_23] : memref<16x128xf32, #tpu.memory_space<vmem>>, vector<16x128xf32>
    tpu.vector_store %arg16[%c0_22, %c0_23], %31 {strides = array<i32>} : memref<16x128xf32, #tpu.memory_space<vmem>>, vector<16x128xf32>,
    %c1_i32 = arith.constant 1 : i32
    %33 = arith.cmpi eq, %arg0, %c1_i32 : i32
    %34 = arith.extui %33 : i1 to i32
    %c0_i32_24 = arith.constant 0 : i32
    %35 = arith.cmpi ne, %34, %c0_i32_24 : i32
    scf.if %35 {
      %c0_25 = arith.constant 0 : index
      %c0_26 = arith.constant 0 : index
      %36 = vector.load %arg16[%c0_25, %c0_26] : memref<16x128xf32, #tpu.memory_space<vmem>>, vector<16x128xf32>
      %c0_27 = arith.constant 0 : index
      %c0_28 = arith.constant 0 : index
      %37 = vector.load %arg15[%c0_27, %c0_28] : memref<16x128xf32, #tpu.memory_space<vmem>>, vector<16x128xf32>
      %c0_29 = arith.constant 0 : index
      %c0_30 = arith.constant 0 : index
      %38 = vector.load %arg11[%c0_29, %c0_30] : memref<16x128xf32, #tpu.memory_space<vmem>>, vector<16x128xf32>
      tpu.vector_store %arg11[%c0_29, %c0_30], %37 {strides = array<i32>} : memref<16x128xf32, #tpu.memory_space<vmem>>, vector<16x128xf32>,
      %c0_31 = arith.constant 0 : index
      %c0_32 = arith.constant 0 : index
      %39 = vector.load %arg12[%c0_31, %c0_32] : memref<16x128xf32, #tpu.memory_space<vmem>>, vector<16x128xf32>
      tpu.vector_store %arg12[%c0_31, %c0_32], %36 {strides = array<i32>} : memref<16x128xf32, #tpu.memory_space<vmem>>, vector<16x128xf32>,
      %40 = arith.addf %36, %37 : vector<16x128xf32>
      %c0_33 = arith.constant 0 : index
      %c0_34 = arith.constant 0 : index
      %41 = vector.load %arg13[%c0_33, %c0_34] : memref<16x128xf32, #tpu.memory_space<vmem>>, vector<16x128xf32>
      tpu.vector_store %arg13[%c0_33, %c0_34], %40 {strides = array<i32>} : memref<16x128xf32, #tpu.memory_space<vmem>>, vector<16x128xf32>,
    } else {
    }
    return
  }
  func.func @transform_0(%arg0: i32) -> (i32, i32) {
    %c0_i32 = arith.constant 0 : i32
    %c0_i32_0 = arith.constant 0 : i32
    %c0_i32_1 = arith.constant 0 : i32
    return %c0_i32, %c0_i32_0 : i32, i32
  }
  func.func @transform_1(%arg0: i32) -> (i32, i32) {
    %c0_i32 = arith.constant 0 : i32
    %c0_i32_0 = arith.constant 0 : i32
    %c0_i32_1 = arith.constant 0 : i32
    return %c0_i32, %c0_i32_0 : i32, i32
  }
  func.func @transform_2(%arg0: i32) -> (i32, i32) {
    %c0_i32 = arith.constant 0 : i32
    %c0_i32_0 = arith.constant 0 : i32
    %c0_i32_1 = arith.constant 0 : i32
    return %c0_i32, %c0_i32_0 : i32, i32
  }
  func.func @transform_3(%arg0: i32) -> (i32, i32) {
    %c0_i32 = arith.constant 0 : i32
    %c0_i32_0 = arith.constant 0 : i32
    %c0_i32_1 = arith.constant 0 : i32
    return %c0_i32, %c0_i32_0 : i32, i32
  }
  func.func @transform_4(%arg0: i32) -> (i32, i32) {
    %c0_i32 = arith.constant 0 : i32
    %c0_i32_0 = arith.constant 0 : i32
    %c0_i32_1 = arith.constant 0 : i32
    return %c0_i32, %c0_i32_0 : i32, i32
  }
  func.func @transform_5(%arg0: i32) -> (i32, i32) {
    %c0_i32 = arith.constant 0 : i32
    %c0_i32_0 = arith.constant 0 : i32
    %c0_i32_1 = arith.constant 0 : i32
    return %c0_i32, %c0_i32_0 : i32, i32
  }
  func.func @transform_6(%arg0: i32) -> (i32, i32, i32) {
    %c0_i32 = arith.constant 0 : i32
    %c0_i32_0 = arith.constant 0 : i32
    %c0_i32_1 = arith.constant 0 : i32
    return %arg0, %c0_i32, %c0_i32_0 : i32, i32, i32
  }
  func.func @transform_7(%arg0: i32) -> (i32, i32, i32) {
    %c0_i32 = arith.constant 0 : i32
    %c0_i32_0 = arith.constant 0 : i32
    %c0_i32_1 = arith.constant 0 : i32
    return %arg0, %c0_i32, %c0_i32_0 : i32, i32, i32
  }
  func.func @transform_8(%arg0: i32) -> (i32, i32, i32) {
    %c0_i32 = arith.constant 0 : i32
    %c0_i32_0 = arith.constant 0 : i32
    %c0_i32_1 = arith.constant 0 : i32
    return %arg0, %c0_i32, %c0_i32_0 : i32, i32, i32
  }
  func.func @transform_9(%arg0: i32) -> (i32, i32, i32) {
    %c0_i32 = arith.constant 0 : i32
    %c0_i32_0 = arith.constant 0 : i32
    %c0_i32_1 = arith.constant 0 : i32
    return %arg0, %c0_i32, %c0_i32_0 : i32, i32, i32
  }
  func.func @transform_10(%arg0: i32) -> (i32, i32) {
    %c0_i32 = arith.constant 0 : i32
    %c0_i32_0 = arith.constant 0 : i32
    %c0_i32_1 = arith.constant 0 : i32
    return %c0_i32, %c0_i32_0 : i32, i32
  }
  func.func @transform_11(%arg0: i32) -> (i32, i32) {
    %c0_i32 = arith.constant 0 : i32
    %c0_i32_0 = arith.constant 0 : i32
    %c0_i32_1 = arith.constant 0 : i32
    return %c0_i32, %c0_i32_0 : i32, i32
  }
  func.func @transform_12(%arg0: i32) -> (i32, i32) {
    %c0_i32 = arith.constant 0 : i32
    %c0_i32_0 = arith.constant 0 : i32
    %c0_i32_1 = arith.constant 0 : i32
    return %c0_i32, %c0_i32_0 : i32, i32
  }
}

</mosaic_0001>

<bundles_post_ra>
// kernel: multi_decoder_rna_forward.1
= control target key start
LH: loop header
LB: loop body
LE: loop exit
PB: predicated region body
PF: predicated region fallthrough
CT: control target
= control target key end

     0   :  { %s1405_s21 = smov 0   ;;  %s1589_s0 = inlined_call_operand.vmem [shape: s32[16,1], index: 0, kind: input, shape index: {}]   ;;  %s1590_s1 = inlined_call_operand.vmem [shape: bf16[16,128], index: 1, kind: input, shape index: {}]   ;;  %s1591_s2 = inlined_call_operand.vmem [shape: bf16[128,128], index: 2, kind: input, shape index: {}]   ;;  %s1592_s3 = inlined_call_operand.vmem [shape: f32[1,128], index: 3, kind: input, shape index: {}]   ;;  %s1593_s4 = inlined_call_operand.vmem [shape: bf16[128,128], index: 4, kind: input, shape index: {}]   ;;  %s1594_s5 = inlined_call_operand.vmem [shape: f32[1,128], index: 5, kind: input, shape index: {}]   ;;  %s1595_s6 = inlined_call_operand.vmem [shape: bf16[2,128,128], index: 6, kind: input, shape index: {}]   ;;  %s1596_s7 = inlined_call_operand.vmem [shape: f32[2,1,128], index: 7, kind: input, shape index: {}]   ;;  %s1597_s8 = inlined_call_operand.vmem [shape: bf16[2,128,128], index: 8, kind: input, shape index: {}]   ;;  %s1598_s9 = inlined_call_operand.vmem [shape: f32[2,1,128], index: 9, kind: input, shape index: {}]   ;;  %s1599_s10 = inlined_call_operand.vmem [shape: f32[16,128], index: 10, kind: output, shape index: {0}]   ;;  %s1600_s11 = inlined_call_operand.vmem [shape: f32[16,128], index: 11, kind: output, shape index: {1}]   ;;  %s1601_s12 = inlined_call_operand.vmem [shape: f32[16,128], index: 12, kind: output, shape index: {2}]  }
   0x1 LB: > { %s1411_s22 = sadd.s32 4294967295, %s1332_s21   ;;  %p1100_p0 = scmp.ge.s32.totalorder %s1332_s21, 1  ;;  %s1332_s21 = sphi %s1405_s21, %s23_s21  }
   0x2   : > { %p378_p1 = scmp.lt.s32.totalorder %s1332_s21, 3 }
   0x4   : > { %p379_p2 = pnand %p1100_p0, %p378_p1 }
   0x5   : > { %p426_p3 = scmp.lt.s32.totalorder (!%p379_p2), %s1411_s22, 1  ;;  %v1419_v0 = vld [vmem:[%s1589_s0] sm:$0xff] (!%p379_p2)  ;;  %v1424_v1 = vld [vmem:[%s1589_s0 + $0x8] sm:$0xff] (!%p379_p2)  ;;  %p1105_p4 = scmp.ne.s32.totalorder (!%p379_p2), %s1411_s22, 0 }
   0x6   : > { %382 = sbr.rel (%p379_p2) target bundleno = 971 (0x3cb), region = 60 }
   0xd   : > { %s1427_s27 = scalar_select %p426_p3, %s1411_s22, 1 }
   0xe   : > { %448 = sbr.rel (%p1105_p4) target bundleno = 486 (0x1e6), region = 64  ;;  %v1291_v2 = vld [vmem:[%s1591_s2] sm:$0xff] (!%p1105_p4)   ;;  %v1334_v3 = vmov (!%p1105_p4), 0.0   ;;  %v1292_v4 = vld [vmem:[%s1591_s2 + $0x8] sm:$0xff] (!%p1105_p4)   ;;  %vm1335_vm0 = vmmov (!%p1105_p4), 0   ;;  %v1336_v5 = vmov (!%p1105_p4), 0   ;;  %v688_v22 = vlaneseq (!%p1105_p4) }
   0xf   : > { %s1150_s28 = sshll.u32 %s1427_s27, 6  ;;  %s433_s13 = scalar_lea.vmem %s1596_s7, %s1427_s27  ;;  %1190 = vmatprep.subr.bf16.mxu0 (!%p1105_p4), %v1334_v3  ;;  %758 = vst [vmem:[#allocation4] sm:$0xff] (!%p1105_p4), %v1334_v3  ;;  %759 = vst [vmem:[#allocation4 + $0x8] sm:$0xff] (!%p1105_p4), %v1334_v3  ;;  %1210 = vmatprep.subr.bf16.mxu1 (!%p1105_p4), %v1334_v3  ;;  %v1293_v6 = vld [vmem:[%s1591_s2 + $0x10] sm:$0xff] (!%p1105_p4)   ;;  %v1300_v7 = vld [vmem:[%s1593_s4] sm:$0xff] (!%p1105_p4)   ;;  %vm711_vm3 = vcmask (!%p1105_p4), 130048  }
  0x10   : > { %s1437_s16 = scalar_lea.vmem %s1595_s6, %s1150_s28  ;;  %s1442_s19 = scalar_lea.vmem %s1597_s8, %s1150_s28  ;;  %1191 = vmatpush3.bf16.msra.mxu0 (!%p1105_p4), %v1291_v2  ;;  %1206 = vmatprep.mubr.msk.bf16.mxu0 (!%p1105_p4), %vm1335_vm0, %v1334_v3  ;;  %v1294_v8 = vld [vmem:[%s1591_s2 + $0x18] sm:$0xff] (!%p1105_p4)   ;;  %v1301_v9 = vld [vmem:[%s1593_s4 + $0x8] sm:$0xff] (!%p1105_p4)   ;;  %v1295_v10 = vld [vmem:[%s1591_s2 + $0x20] sm:$0xff] (!%p1105_p4)   ;;  %v689_v23 = vand.u32 (!%p1105_p4), 127, %v688_v22 }
  0x11   : > { %s441_s24 = scalar_lea.vmem %s1598_s9, %s1427_s27  ;;  %1192 = vmatprep.subr.bf16.mxu0 (!%p1105_p4), %v1334_v3  ;;  %1290 = vset.pattern.permute.xlu0 (!%p1105_p4), %v1336_v5  ;;  %v1302_v11 = vld [vmem:[%s1593_s4 + $0x10] sm:$0xff] (!%p1105_p4)   ;;  %v1296_v12 = vld [vmem:[%s1591_s2 + $0x28] sm:$0xff] (!%p1105_p4)   ;;  %v1303_v13 = vld [vmem:[%s1593_s4 + $0x18] sm:$0xff] (!%p1105_p4)  }
  0x12   : > { %691 = vperm.xlu0 (!%p1105_p4), %1290, %v1419_v0   ;;  %1226 = vmatprep.mubr.msk.bf16.mxu1 (!%p1105_p4), %vm1335_vm0, %v1334_v3  ;;  %v1297_v14 = vld [vmem:[%s1591_s2 + $0x30] sm:$0xff] (!%p1105_p4)   ;;  %v1304_v15 = vld [vmem:[%s1593_s4 + $0x20] sm:$0xff] (!%p1105_p4)   ;;  %v1298_v16 = vld [vmem:[%s1591_s2 + $0x38] sm:$0xff] (!%p1105_p4)  }
  0x13   : > { %1211 = vmatpush3.bf16.msra.mxu1 (!%p1105_p4), %v1300_v7  ;;  %v1305_v17 = vld [vmem:[%s1593_s4 + $0x28] sm:$0xff] (!%p1105_p4)   ;;  %v1299_v18 = vld [vmem:[%s1590_s1] sm:$0xff] (!%p1105_p4)   ;;  %v1307_v20 = vld [vmem:[%s1593_s4 + $0x30] sm:$0xff] (!%p1105_p4)  }
  0x14   : > { %1193 = vmatpush3.bf16.msra.mxu0 (!%p1105_p4), %v1292_v4  ;;  %1212 = vmatprep.subr.bf16.mxu1 (!%p1105_p4), %v1334_v3  ;;  %v1306_v19 = vld [vmem:[%s1590_s1] sm:$0xff] (!%p1105_p4)   ;;  %v1308_v21 = vld [vmem:[%s1593_s4 + $0x38] sm:$0xff] (!%p1105_p4)  }
  0x15   : > { %1194 = vmatprep.subr.bf16.mxu0 %v1334_v3  ;;  %v1106_v29 = vld [vmem:[%s1592_s3] ss:$0 sm:$0xff] }
  0x16   : > { %694 = vperm.xlu0 %1290, %v1424_v1   ;;  %v1116_v44 = vld [vmem:[%s1594_s5] ss:$0 sm:$0xff] }
  0x17   : > { %1213 = vmatpush3.bf16.msra.mxu1 %v1301_v9 }
  0x18   : > { %1195 = vmatpush3.bf16.msra.mxu0 %v1293_v6  ;;  %1214 = vmatprep.subr.bf16.mxu1 %v1334_v3 }
  0x19   : > { %1196 = vmatprep.subr.bf16.mxu0 %v1334_v3 }
  0x1b   : > { %1215 = vmatpush3.bf16.msra.mxu1 %v1302_v11 }
  0x1c   : > { %1197 = vmatpush3.bf16.msra.mxu0 %v1294_v8  ;;  %1216 = vmatprep.subr.bf16.mxu1 %v1334_v3 }
  0x1d   : > { %1198 = vmatprep.subr.bf16.mxu0 %v1334_v3 }
  0x1f   : > { %1217 = vmatpush3.bf16.msra.mxu1 %v1303_v13 }
  0x20   : > { %1199 = vmatpush3.bf16.msra.mxu0 %v1295_v10  ;;  %1218 = vmatprep.subr.bf16.mxu1 %v1334_v3 }
  0x21   : > { %1200 = vmatprep.subr.bf16.mxu0 %v1334_v3 }
  0x23   : > { %1219 = vmatpush3.bf16.msra.mxu1 %v1304_v15 }
  0x24   : > { %1201 = vmatpush3.bf16.msra.mxu0 %v1296_v12  ;;  %1220 = vmatprep.subr.bf16.mxu1 %v1334_v3 }
  0x25   : > { %1202 = vmatprep.subr.bf16.mxu0 %v1334_v3 }
  0x27   : > { %1221 = vmatpush3.bf16.msra.mxu1 %v1305_v17 }
  0x28   : > { %1203 = vmatpush3.bf16.msra.mxu0 %v1297_v14  ;;  %1222 = vmatprep.subr.bf16.mxu1 %v1334_v3 }
  0x29   : > { %1204 = vmatprep.subr.bf16.mxu0 %v1334_v3 }
  0x2b   : > { %1223 = vmatpush3.bf16.msra.mxu1 %v1307_v20 }
  0x2c   : > { %1205 = vmatpush3.bf16.msra.mxu0 %v1298_v16  ;;  %1224 = vmatprep.subr.bf16.mxu1 %v1334_v3 }
  0x2d   : > { %1230 = vmatprep.subr.bf16.mxu0 %v1334_v3 }
  0x2f   : > { %1207 = vmatmul.mubr.bf16.vlgmr.msra.gmra.mrb[0].mxu0 %v1299_v18  ;;  %1225 = vmatpush3.bf16.msra.mxu1 %v1308_v21 }
  0x30   : > { %1232 = vmatprep.mubr.msk.bf16.mxu0 %vm1335_vm0, %v1334_v3  ;;  %1231 = vmatpush3.bf16.msra.mxu0 %v1306_v19 }
  0x91   : > { %v692_v24 = vpop.permute.xlu0 %691 }
  0x92   : > { %vm696_vm1 = vcmp.eq.s32.totalorder %v692_v24, %v689_v23 }
  0x93   : > { %v1125_v25 = vsel %vm696_vm1, 1.0, %v1334_v3 }
  0x95   : > { %v695_v26 = vpop.permute.xlu0 %694 }
  0x96   : > { %vm697_vm2 = vcmp.eq.s32.totalorder %v695_v26, %v689_v23 }
  0x97   : > { %v1126_v27 = vsel %vm697_vm2, 1.0, %v1334_v3 }
  0x98   : > { %v702_v28 = vpack.c.bf16 %v1126_v27, %v1125_v25 }
  0x9a   : > { %1233 = vmatmul.mubr.msk.bf16.vlgmr.msra.gmra.mrb[4].mxu0 %vm711_vm3, %v702_v28 }
 0x102   : > { %v562_v30 = vpop.f32.mrb[0].mxu0 }
 0x103   : > { %v563_v31 = vadd.f32 %v1106_v29, %v562_v30  ;;  %v1208_v32 = vpop.f32.mrb[1].mxu0 }
 0x104   : > { %v565_v33 = vpop.f32.mrb[2].mxu0 }
 0x105   : > { %v566_v34 = vadd.f32 %v1106_v29, %v565_v33  ;;  %v1209_v35 = vpop.f32.mrb[3].mxu0  ;;  %v569_v36 = vmax.f32 %v563_v31, 0.0 }
 0x107   : > { %v570_v37 = vmax.f32 %v566_v34, 0.0 }
 0x109   : > { %v571_v38 = vpack.c.bf16 %v570_v37, %v569_v36 }
 0x10b   : > { %1227 = vmatmul.mubr.bf16.vlgmr.msra.gmra.mrb[0].mxu1 %v571_v38 }
 0x16d   : > { %v749_v39 = vpop.f32.mrb[4].mxu0 }
 0x16e   : > { %v1234_v40 = vpop.f32.mrb[5].mxu0 }
 0x16f   : > { %v752_v41 = vpop.f32.mrb[6].mxu0 }
 0x170   : > { %v756_v42 = vpack.c.bf16 %v752_v41, %v749_v39  ;;  %v1235_v43 = vpop.f32.mrb[7].mxu0 }
 0x172   : > { %757 = vst [vmem:[#allocation2] sm:$0xff] %v756_v42 }
 0x1de   : > { %v677_v45 = vpop.f32.mrb[0].mxu1 }
 0x1df   : > { %v678_v46 = vadd.f32 %v1116_v44, %v677_v45  ;;  %v1228_v47 = vpop.f32.mrb[1].mxu1 }
 0x1e0   : > { %v680_v48 = vpop.f32.mrb[2].mxu1 }
 0x1e1   : > { %v684_v49 = vmax.f32 %v678_v46, 0.0  ;;  %v681_v50 = vadd.f32 %v1116_v44, %v680_v48  ;;  %v1229_v51 = vpop.f32.mrb[3].mxu1 }
 0x1e3   : > { %686 = vst [vmem:[#allocation3] sm:$0xff] %v684_v49  ;;  %v685_v52 = vmax.f32 %v681_v50, 0.0 }
 0x1e5   : > { %687 = vst [vmem:[#allocation3 + $0x8] sm:$0xff] %v685_v52 }
 0x1e6 PF: > { %v1310_v53 = vld [vmem:[%s1437_s16] sm:$0xff]   ;;  %v1337_v54 = vmov 0.0   ;;  %v1311_v55 = vld [vmem:[%s1437_s16 + $0x8] sm:$0xff]   ;;  %vm1338_vm4 = vmmov 0   ;;  %v1312_v56 = vld [vmem:[%s1437_s16 + $0x10] sm:$0xff]   ;;  %v992_v9 = vstv %s1411_s22  ;;  %v1339_v10 = vmov 0  }
 0x1e7   : > { %1236 = vmatprep.subr.bf16.mxu0 %v1337_v54  ;;  %1256 = vmatprep.subr.bf16.mxu1 %v1337_v54  ;;  %v1318_v57 = vld [vmem:[%s1442_s19] sm:$0xff]   ;;  %v1313_v58 = vld [vmem:[%s1437_s16 + $0x18] sm:$0xff]   ;;  %v1319_v59 = vld [vmem:[%s1442_s19 + $0x8] sm:$0xff]   ;;  %vm993_vm5 = vcmp.eq.s32.totalorder %v1419_v0, %v992_v9  ;;  %vm994_vm6 = vcmp.eq.s32.totalorder %v1424_v1, %v992_v9  ;;  %p1147_p5 = scmp.ne.s32.totalorder %s1411_s22, 1 }
 0x1e8   : > { %1237 = vmatpush3.bf16.msra.mxu0 %v1310_v53  ;;  %1252 = vmatprep.mubr.msk.bf16.mxu0 %vm1338_vm4, %v1337_v54  ;;  %v1314_v60 = vld [vmem:[%s1437_s16 + $0x20] sm:$0xff]   ;;  %v1320_v61 = vld [vmem:[%s1442_s19 + $0x10] sm:$0xff]   ;;  %v1315_v62 = vld [vmem:[%s1437_s16 + $0x28] sm:$0xff]   ;;  %v995_v11 = vsel %vm993_vm5, 1, %v1339_v10  ;;  %v996_v12 = vsel %vm994_vm6, 1, %v1339_v10 }
 0x1e9   : > { %1238 = vmatprep.subr.bf16.mxu0 %v1337_v54  ;;  %1272 = vmatprep.mubr.msk.bf16.mxu1 %vm1338_vm4, %v1337_v54  ;;  %v1321_v63 = vld [vmem:[%s1442_s19 + $0x18] sm:$0xff]   ;;  %v1316_v2 = vld [vmem:[%s1437_s16 + $0x30] sm:$0xff]   ;;  %v1322_v3 = vld [vmem:[%s1442_s19 + $0x20] sm:$0xff]  }
 0x1ea   : > { %1257 = vmatpush3.bf16.msra.mxu1 %v1318_v57  ;;  %v1317_v4 = vld [vmem:[%s1437_s16 + $0x38] sm:$0xff]   ;;  %v1323_v5 = vld [vmem:[%s1442_s19 + $0x28] sm:$0xff]   ;;  %v760_v6 = vld [vmem:[#allocation2] sm:$0xff]  ;;  %1309 = vset.pattern.permute.xlu0 %v1339_v10 }
 0x1eb   : > { %1258 = vmatprep.subr.bf16.mxu1 %v1337_v54  ;;  %v1324_v7 = vld [vmem:[%s1442_s19 + $0x30] sm:$0xff]   ;;  %v1325_v8 = vld [vmem:[%s1442_s19 + $0x38] sm:$0xff]   ;;  %998 = vperm.xlu0 %1309, %v995_v11   ;;  %v1129_v13 = vld [vmem:[%s433_s13] ss:$0 sm:$0xff] }
 0x1ec   : > { %1239 = vmatpush3.bf16.msra.mxu0 %v1311_v55  ;;  %v1138_v22 = vld [vmem:[%s441_s24] ss:$0 sm:$0xff]  ;;  %v990_v28 = vld [vmem:[#allocation4] sm:$0xff]  ;;  %v1017_v38 = vld [vmem:[#allocation3] sm:$0xff] (!%p1147_p5) }
 0x1ed   : > { %1240 = vmatprep.subr.bf16.mxu0 %v1337_v54  ;;  %v991_v34 = vld [vmem:[#allocation4 + $0x8] sm:$0xff]  ;;  %v1018_v39 = vld [vmem:[#allocation3 + $0x8] sm:$0xff] (!%p1147_p5)  ;;  %1019 = vst [vmem:[%s1599_s10] sm:$0xff] (!%p1147_p5), %v1017_v38 }
 0x1ee   : > { %1259 = vmatpush3.bf16.msra.mxu1 %v1319_v59  ;;  %1020 = vst [vmem:[%s1599_s10 + $0x8] sm:$0xff] (!%p1147_p5), %v1018_v39 }
 0x1ef   : > { %1260 = vmatprep.subr.bf16.mxu1 %v1337_v54  ;;  %1001 = vperm.xlu0 %1309, %v996_v12  }
 0x1f0   : > { %1241 = vmatpush3.bf16.msra.mxu0 %v1312_v56 }
 0x1f1   : > { %1242 = vmatprep.subr.bf16.mxu0 %v1337_v54 }
 0x1f2   : > { %1261 = vmatpush3.bf16.msra.mxu1 %v1320_v61 }
 0x1f3   : > { %1262 = vmatprep.subr.bf16.mxu1 %v1337_v54 }
 0x1f4   : > { %1243 = vmatpush3.bf16.msra.mxu0 %v1313_v58 }
 0x1f5   : > { %1244 = vmatprep.subr.bf16.mxu0 %v1337_v54 }
 0x1f6   : > { %1263 = vmatpush3.bf16.msra.mxu1 %v1321_v63 }
 0x1f7   : > { %1264 = vmatprep.subr.bf16.mxu1 %v1337_v54 }
 0x1f8   : > { %1245 = vmatpush3.bf16.msra.mxu0 %v1314_v60 }
 0x1f9   : > { %1246 = vmatprep.subr.bf16.mxu0 %v1337_v54 }
 0x1fa   : > { %1265 = vmatpush3.bf16.msra.mxu1 %v1322_v3 }
 0x1fb   : > { %1266 = vmatprep.subr.bf16.mxu1 %v1337_v54 }
 0x1fc   : > { %1247 = vmatpush3.bf16.msra.mxu0 %v1315_v62 }
 0x1fd   : > { %1248 = vmatprep.subr.bf16.mxu0 %v1337_v54 }
 0x1fe   : > { %1267 = vmatpush3.bf16.msra.mxu1 %v1323_v5 }
 0x1ff   : > { %1268 = vmatprep.subr.bf16.mxu1 %v1337_v54 }
 0x200   : > { %1249 = vmatpush3.bf16.msra.mxu0 %v1316_v2 }
 0x201   : > { %1250 = vmatprep.subr.bf16.mxu0 %v1337_v54 }
 0x202   : > { %1269 = vmatpush3.bf16.msra.mxu1 %v1324_v7 }
 0x203   : > { %1270 = vmatprep.subr.bf16.mxu1 %v1337_v54 }
 0x204   : > { %1251 = vmatpush3.bf16.msra.mxu0 %v1317_v4 }
 0x206   : > { %1271 = vmatpush3.bf16.msra.mxu1 %v1325_v8 }
 0x207   : > { %1253 = vmatmul.mubr.bf16.vlgmr.msra.gmra.mrb[0].mxu0 %v760_v6 }
 0x26a   : > { %v999_v1 = vpop.permute.xlu0 %998 }
 0x26b   : > { %vm1003_vm7 = vcmp.eq.s32.totalorder %v999_v1, 1 }
 0x26e   : > { %v1002_v29 = vpop.permute.xlu0 %1001 }
 0x26f   : > { %vm1004_vm8 = vcmp.eq.s32.totalorder %v1002_v29, 1 }
 0x2da   : > { %v866_v14 = vpop.f32.mrb[0].mxu0 }
 0x2db   : > { %v867_v15 = vadd.f32 %v1129_v13, %v866_v14  ;;  %v1254_v16 = vpop.f32.mrb[1].mxu0 }
 0x2dc   : > { %v869_v17 = vpop.f32.mrb[2].mxu0 }
 0x2dd   : > { %v870_v18 = vadd.f32 %v1129_v13, %v869_v17  ;;  %v1255_v19 = vpop.f32.mrb[3].mxu0  ;;  %v873_v20 = vmax.f32 %v867_v15, 0.0 }
 0x2df   : > { %v874_v0 = vmax.f32 %v870_v18, 0.0 }
 0x2e1   : > { %v875_v21 = vpack.c.bf16 %v874_v0, %v873_v20 }
 0x2e3   : > { %1273 = vmatmul.mubr.bf16.vlgmr.msra.gmra.mrb[0].mxu1 %v875_v21 }
 0x3b6   : > { %v981_v23 = vpop.f32.mrb[0].mxu1 }
 0x3b7   : > { %v982_v24 = vadd.f32 %v1138_v22, %v981_v23  ;;  %v1274_v25 = vpop.f32.mrb[1].mxu1 }
 0x3b8   : > { %v984_v26 = vpop.f32.mrb[2].mxu1 }
 0x3b9   : > { %v988_v27 = vmax.f32 %v982_v24, 0.0  ;;  %v985_v30 = vadd.f32 %v1138_v22, %v984_v26  ;;  %v1275_v31 = vpop.f32.mrb[3].mxu1 }
 0x3ba   : > { %1014 = sbr.rel (%p1147_p5) target bundleno = 971 (0x3cb), region = 68 }
 0x3bb   : > { %v1005_v32 = vsel %vm1003_vm7, %v988_v27, 0.0  ;;  %v989_v33 = vmax.f32 %v985_v30, 0.0 }
 0x3bc   : > { %v1007_v35 = vadd.f32 %v1005_v32, %v990_v28 }
 0x3bd   : > { %v1006_v36 = vsel %vm1004_vm8, %v989_v33, 0.0 }
 0x3be   : > { %1009 = vst [vmem:[#allocation4] sm:$0xff] %v1007_v35  ;;  %v1008_v37 = vadd.f32 %v1006_v36, %v991_v34 }
 0x3c0   : > { %1010 = vst [vmem:[#allocation4 + $0x8] sm:$0xff] %v1008_v37 }
 0x3c5   : > { %v1015_v40 = vld [vmem:[#allocation4] sm:$0xff] }
 0x3c6   : > { %1021 = vst [vmem:[%s1600_s11] sm:$0xff] %v1015_v40  ;;  %v1023_v42 = vadd.f32 %v1017_v38, %v1015_v40 }
 0x3c7   : > { %v1016_v41 = vld [vmem:[#allocation4 + $0x8] sm:$0xff] }
 0x3c8   : > { %1022 = vst [vmem:[%s1600_s11 + $0x8] sm:$0xff] %v1016_v41  ;;  %v1024_v43 = vadd.f32 %v1018_v39, %v1016_v41  ;;  %1025 = vst [vmem:[%s1601_s12] sm:$0xff] %v1023_v42 }
 0x3ca   : > { %1026 = vst [vmem:[%s1601_s12 + $0x8] sm:$0xff] %v1024_v43 }
 0x3cb PF: > { %s23_s21 = sadd.s32 1, %s1332_s21  }
 0x3cc   : > { %p20_p6 = scmp.ge.s32.totalorder %s23_s21, 4  }
 0x3ce   :  { %22 = sbr.rel (!%p20_p6) target bundleno = 1 (0x1), region = 119 }

</bundles_post_ra>
